<compile_context>
chip_gen: v5e
topology: v5e:2x2
jax: 0.10.0
libtpu: 0.0.40
codegen_flags: <defaults>
</compile_context>

<pallas_src>
import jax
import jax.numpy as jnp
from jax.experimental import pallas as pl
from jax.experimental.pallas import tpu as pltpu

_LANE = 128
_VMEM_BLOCK_BUDGET = 8 * 1024 * 1024    # bytes for double-buffered in+out blocks
_VMEM_LIMIT_BYTES = 32 * 1024 * 1024    # scoped VMEM limit (safe on v5e/v6e/v7x)
_MIN_PARALLEL_BLOCKS = 4                # keep >= this many parallel grid blocks


def _round_down(x: int, m: int) -> int:
    return (x // m) * m


def _max_over_c_kernel(x_ref, o_ref):
    """C fits in one block: o = max over the leading C axis of the block."""
    o_ref[...] = jnp.max(x_ref[...], axis=0, keepdims=True)


def _make_running_max_kernel(c_total: int, c_tile: int):
    """C tiled over a trailing 'arbitrary' grid axis; running max into o_ref."""
    rem = c_total % c_tile  # valid channels in the ragged last C block (0 -> exact)

    def kernel(x_ref, o_ref):
        c_idx = pl.program_id(2)
        blk = x_ref[...]
        blk_max = jnp.max(blk, axis=0, keepdims=True)
        if rem:
            # Last C block is ragged: only the first `rem` channels are real data.
            # Redo the reduction over a *static* slice and pick the right result —
            # this avoids any big iota/select temporaries or identity padding.
            tail_max = jnp.max(blk[:rem], axis=0, keepdims=True)
            is_last = c_idx == pl.num_programs(2) - 1
            blk_max = jnp.where(is_last, tail_max, blk_max)

        @pl.when(c_idx == 0)
        def _init():
            o_ref[...] = blk_max

        @pl.when(c_idx > 0)
        def _accumulate():
            o_ref[...] = jnp.maximum(o_ref[...], blk_max)

    return kernel


def fuzzy_or_rule_layer(x: jax.Array) -> jax.Array:
    """torch.max(x, dim=1).values for an NCHW tensor, as a Pallas TPU kernel."""
    B, C, H, W = x.shape
    HW = H * W
    dtype = x.dtype
    itemsize = jnp.dtype(dtype).itemsize
    sublane = max(8, 32 // max(1, itemsize))           # 8 f32 / 16 bf16 / 32 int8
    min_sp_tiles = max(1, pl.cdiv(_MIN_PARALLEL_BLOCKS, B))

    lane_aligned = (HW % _LANE) == 0

    if lane_aligned:
        # Fast path: lane axis is always a dense 128-wide vector; C is a leading
        # block dim -> pure elementwise VPU max, no cross-sublane work.
        rows = HW // _LANE
        x_view = x.reshape(B, C, rows, _LANE)
        out_struct = jax.ShapeDtypeStruct((B, 1, rows, _LANE), dtype)

        cap_vmem = _VMEM_BLOCK_BUDGET // (2 * (C + 1) * _LANE * itemsize)
        if cap_vmem >= sublane:
            # Whole C fits in one block.
            c_tile = C
            cap = min(cap_vmem, pl.cdiv(rows, min_sp_tiles))
            cap = max(sublane, _round_down(cap, sublane))
            row_tile = rows if cap >= rows else cap
        else:
            # C too large for one block: modest spatial tile, tile C as well.
            target = min(512, pl.cdiv(rows, min_sp_tiles))
            if target >= rows:
                row_tile = rows
            else:
                row_tile = max(sublane, _round_down(target, sublane))
                row_tile = rows if row_tile >= rows else row_tile
            c_tile = max(1, _VMEM_BLOCK_BUDGET // (2 * row_tile * _LANE * itemsize) - 1)
            c_tile = min(c_tile, C)

        sp_tiles = pl.cdiv(rows, row_tile)
        c_tiles = pl.cdiv(C, c_tile)

        if c_tiles == 1:
            grid = (B, sp_tiles)
            in_spec = pl.BlockSpec((None, C, row_tile, _LANE),
                                   lambda b, s: (b, 0, s, 0))
            out_spec = pl.BlockSpec((None, 1, row_tile, _LANE),
                                    lambda b, s: (b, 0, s, 0))
            kernel = _max_over_c_kernel
            dim_sem = ("parallel", "parallel")
        else:
            grid = (B, sp_tiles, c_tiles)
            in_spec = pl.BlockSpec((None, c_tile, row_tile, _LANE),
                                   lambda b, s, c: (b, c, s, 0))
            out_spec = pl.BlockSpec((None, 1, row_tile, _LANE),
                                    lambda b, s, c: (b, 0, s, 0))
            kernel = _make_running_max_kernel(C, c_tile)
            dim_sem = ("parallel", "parallel", "arbitrary")
    else:
        # Ragged spatial path: block straight over (B, C, HW); Pallas masks the
        # ragged last lane chunk, so no padding copy of the input is needed.  The
        # C-reduce runs over the sublane axis (XLU / strided maxes) — free slack
        # in an HBM-bandwidth-bound kernel.
        x_view = x.reshape(B, C, HW)
        out_struct = jax.ShapeDtypeStruct((B, 1, HW), dtype)

        c_pad = pl.cdiv(C, sublane) * sublane          # sublane-padded VMEM footprint
        cap_vmem = _VMEM_BLOCK_BUDGET // (2 * (c_pad + sublane) * itemsize)
        if cap_vmem >= _LANE:
            c_tile = C
            cap = min(cap_vmem, pl.cdiv(HW, min_sp_tiles))
            cap = max(_LANE, _round_down(cap, _LANE))
            hw_tile = HW if cap >= HW else cap
        else:
            target = min(64 * _LANE, pl.cdiv(HW, min_sp_tiles))
            if target >= HW:
                hw_tile = HW
            else:
                hw_tile = max(_LANE, _round_down(target, _LANE))
                hw_tile = HW if hw_tile >= HW else hw_tile
            c_tile = max(sublane,
                         _round_down(_VMEM_BLOCK_BUDGET // (2 * hw_tile * itemsize) - sublane,
                                     sublane))
            c_tile = min(c_tile, C)

        sp_tiles = pl.cdiv(HW, hw_tile)
        c_tiles = pl.cdiv(C, c_tile)

        if c_tiles == 1:
            grid = (B, sp_tiles)
            in_spec = pl.BlockSpec((None, C, hw_tile), lambda b, s: (b, 0, s))
            out_spec = pl.BlockSpec((None, 1, hw_tile), lambda b, s: (b, 0, s))
            kernel = _max_over_c_kernel
            dim_sem = ("parallel", "parallel")
        else:
            grid = (B, sp_tiles, c_tiles)
            in_spec = pl.BlockSpec((None, c_tile, hw_tile), lambda b, s, c: (b, c, s))
            out_spec = pl.BlockSpec((None, 1, hw_tile), lambda b, s, c: (b, 0, s))
            kernel = _make_running_max_kernel(C, c_tile)
            dim_sem = ("parallel", "parallel", "arbitrary")

    out = pl.pallas_call(
        kernel,
        out_shape=out_struct,
        grid=grid,
        in_specs=[in_spec],
        out_specs=out_spec,
        compiler_params=pltpu.CompilerParams(
            dimension_semantics=dim_sem,
            vmem_limit_bytes=_VMEM_LIMIT_BYTES,
        ),
    )(x_view)

    return out.reshape(B, H, W)


if __name__ == "__main__":
    key = jax.random.PRNGKey(0)

    # Primary shape implied by the module: NCHW, max over channels.
    B, C, H, W = 2, 4, 16, 16
    x = jax.random.uniform(key, (B, C, H, W), dtype=jnp.float32)
    out = fuzzy_or_rule_layer(x)
    jax.block_until_ready(out)
    ref = jnp.max(x, axis=1)
    assert out.shape == (B, H, W)
    assert jnp.allclose(out, ref), "mismatch vs reference (lane-aligned path)"

    # Ragged spatial extent (HW % 128 != 0) and C not a multiple of 8:
    # exercises the no-padding sublane-reduce path with boundary clipping.
    x2 = jax.random.normal(jax.random.PRNGKey(1), (2, 3, 14, 14), dtype=jnp.float32)
    out2 = fuzzy_or_rule_layer(x2)
    jax.block_until_ready(out2)
    assert out2.shape == (2, 14, 14)
    assert jnp.allclose(out2, jnp.max(x2, axis=1)), "mismatch vs reference (ragged path)"

    # Large C: exercises the trailing "arbitrary" C grid axis with a running max
    # and a ragged last C block (1040 % 1023 != 0).
    x3 = jax.random.normal(jax.random.PRNGKey(2), (1, 1040, 64, 64), dtype=jnp.float32)
    out3 = fuzzy_or_rule_layer(x3)
    jax.block_until_ready(out3)
    assert out3.shape == (1, 64, 64)
    assert jnp.allclose(out3, jnp.max(x3, axis=1)), "mismatch vs reference (large-C path)"

    print("KERNEL_OK")
</pallas_src>

<mosaic_0001>
module attributes {stable_mosaic.version = 11 : i64} {
  func.func @_max_over_c_kernel(%arg0: i32, %arg1: i32, %arg2: memref<1x4x2x128xf32, #tpu.memory_space<vmem>>, %arg3: memref<1x1x2x128xf32, #tpu.memory_space<vmem>>) attributes {dimension_semantics = [#tpu.dimension_semantics<parallel>, #tpu.dimension_semantics<parallel>], iteration_bounds = array<i64: 2, 1>, scalar_prefetch = 0 : i64, scratch_operands = 0 : i64, tpu.core_type = #tpu.core_type<tc>, window_params = [{transform_indices = @transform_0, window_bounds = array<i64: 1, 4, 2, 128>}, {transform_indices = @transform_1, window_bounds = array<i64: 1, 1, 2, 128>}]} {
    %c0 = arith.constant 0 : index
    %c0_0 = arith.constant 0 : index
    %c0_1 = arith.constant 0 : index
    %c0_2 = arith.constant 0 : index
    %0 = vector.load %arg2[%c0, %c0_0, %c0_1, %c0_2] : memref<1x4x2x128xf32, #tpu.memory_space<vmem>>, vector<1x4x2x128xf32>
    %1 = vector.shape_cast %0 : vector<1x4x2x128xf32> to vector<4x2x128xf32>
    %cst = arith.constant dense<0xFF800000> : vector<2x128xf32>
    %2 = vector.multi_reduction <maximumf>, %1, %cst [0] : vector<4x2x128xf32> to vector<2x128xf32>
    %3 = vector.shape_cast %2 : vector<2x128xf32> to vector<1x2x128xf32>
    %c0_3 = arith.constant 0 : index
    %c0_4 = arith.constant 0 : index
    %c0_5 = arith.constant 0 : index
    %c0_6 = arith.constant 0 : index
    %4 = vector.load %arg3[%c0_3, %c0_4, %c0_5, %c0_6] : memref<1x1x2x128xf32, #tpu.memory_space<vmem>>, vector<1x1x2x128xf32>
    %5 = vector.shape_cast %4 : vector<1x1x2x128xf32> to vector<1x2x128xf32>
    %6 = vector.shape_cast %3 : vector<1x2x128xf32> to vector<1x1x2x128xf32>
    tpu.vector_store %arg3[%c0_3, %c0_4, %c0_5, %c0_6], %6 {strides = array<i32>} : memref<1x1x2x128xf32, #tpu.memory_space<vmem>>, vector<1x1x2x128xf32>,
    return
  }
  func.func @transform_0(%arg0: i32, %arg1: i32) -> (i32, i32, i32, i32) {
    %c0_i32 = arith.constant 0 : i32
    %c0_i32_0 = arith.constant 0 : i32
    %c0_i32_1 = arith.constant 0 : i32
    return %arg0, %c0_i32, %arg1, %c0_i32_0 : i32, i32, i32, i32
  }
  func.func @transform_1(%arg0: i32, %arg1: i32) -> (i32, i32, i32, i32) {
    %c0_i32 = arith.constant 0 : i32
    %c0_i32_0 = arith.constant 0 : i32
    %c0_i32_1 = arith.constant 0 : i32
    return %arg0, %c0_i32, %arg1, %c0_i32_0 : i32, i32, i32, i32
  }
}

</mosaic_0001>

<bundles_post_ra>
// kernel: tpu_custom_call.1
= control target key start
LH: loop header
LB: loop body
LE: loop exit
PB: predicated region body
PF: predicated region fallthrough
CT: control target
= control target key end

     0   :  { %6 = vsyncpa [#allocation3], 0  ;;  %s591_s0 = inlined_call_operand.hbm [shape: f32[2,4,2,128], index: 0, kind: input, shape index: {}]   ;;  %s592_s1 = inlined_call_operand.hbm [shape: f32[2,1,2,128], index: 1, kind: output, shape index: {}]  }
   0x1   :  { %8 = vsyncpa [#allocation3 + $0x1], 0 }
   0x2   :  { %9 = vsyncpa [#allocation4], 0 }
   0x3   :  { %11 = vsyncpa [#allocation4 + $0x1], 0  ;;  %s470_s6 = smov 0   ;;  %s472_s7 = smov 0  }
   0x4   :  { %s474_s8 = smov 0   ;;  %s476_s9 = smov 0  }
   0x5   :  { %s478_s10 = smov 0   ;;  %s480_s11 = smov 0  }
   0x6 LB: > { %s265_s12 = sadd.s32 4294967295, %s456_s11   ;;  %s266_s13 = sadd.s32 4294967294, %s456_s11   ;;  %s456_s11 = sphi %s480_s11, %s17_s11   ;;  %s452_s10 = sphi %s478_s10, %s601_s10   ;;  %s448_s9 = sphi %s476_s9, %s600_s9   ;;  %s444_s8 = sphi %s474_s8, %s599_s8   ;;  %s440_s7 = sphi %s472_s7, %s598_s7   ;;  %s436_s6 = sphi %s470_s6, %s597_s6  }
   0x7   : > { %s29_s14 = sadd.s32 1, %s452_s10  ;;  %s38_s15 = sadd.s32 1, %s444_s8 }
   0x8   : > { %p31_p0 = scmp.ge.s32.totalorder %s29_s14, 2  ;;  %p45_p1 = scmp.ne.s32.totalorder %s444_s8, %s440_s7 }
   0x9   : > { %p46_p2 = scmp.eq.s32.totalorder %s456_s11, 0  ;;  %p51_p3 = scmp.ne.s32.totalorder %s440_s7, %s436_s6 }
   0xa   : > { %s603_s14 = smov (%p31_p0, %s29_s14), 0  ;;  %p52_p5 = scmp.eq.s32.totalorder %s265_s12, 0 }
   0xb   : > { %p511_p4 = por %p46_p2, %p45_p1  ;;  %s33_s17 = ssub.s32 %s452_s10, %s603_s14 }
   0xc   : > { %p77_p6 = scmp.eq.s32.totalorder %s265_s12, 1  ;;  %p36_p7 = scmp.eq.s32.totalorder %s33_s17, 0 }
   0xd   : > { %p517_p8 = por %p52_p5, %p51_p3  ;;  %p83_p10 = scmp.eq.s32.totalorder %s266_s13, 1 }
   0xe   : > { %p521_p9 = por %p77_p6, %p45_p1  ;;  %p268_p12 = scmp.ge.s32.totalorder %s456_s11, 2 }
   0xf   : > { %s526_s20 = scalar_select %p36_p7, %s444_s8, %s38_s15  }
  0x10   : > { %p528_p11 = por %p83_p10, %p51_p3  ;;  %p292_p13 = scmp.lt.s32.totalorder %s456_s11, 2 }
  0x11   : > { %s103_s22 = sand.u32 1, %s444_s8   ;;  %s279_s24 = sshll.u32 %s452_s10, 3 }
  0x12   : > { %s269_s23 = sshll.u32 %s103_s22, 3  ;;  %s113_s27 = scalar_lea.hbm %s591_s0, %s279_s24 }
  0x13   : > { %s107_s28 = scalar_lea.vmem [#allocation2], %s269_s23  ;;  %s114_s30 = sshll.u32 %s113_s27, 4  ;;  %s115_s30 = int_to_ptr.hbm [resolvable:$true] %s114_s30 }
  0x14   : > { %s116_s29 = sshll.u32 %s107_s28, 4  ;;  %p285_p0 = pnand %p292_p13, %p511_p4  ;;  %s117_s29 = int_to_ptr.vmem [resolvable:$true] %s116_s29 }
  0x15   : > { %p272_p1 = scmp.ge.s32.totalorder %s456_s11, 1  ;;  %s104_s2 = scalar_lea.sflag [#allocation3], %s103_s22 }
  0x16   : > { %s458_s3 = smov 32   ;;  %s459_s4 = smov 2  }
  0x17   : > { %287 = dma.hbm_to_vmem [thread:$0]  (!%p285_p0), %s115_s30, 128, %s117_s29, %s104_s2, %s458_s3, %s458_s3, %s459_s4  }
  0x18   : > { %p124_p2 = scmp.lt.s32.totalorder %s456_s11, 3 }
  0x1a   : > { %p125_p3 = pnand %p272_p1, %p124_p2 }
  0x1b   : > { %s544_s5 = sand.u32 (!%p125_p3), 1, %s440_s7  }
  0x1c   : > { %128 = sbr.rel (%p125_p3) target bundleno = 50 (0x32), region = 24  ;;  %s273_s12 = sshll.u32 (!%p125_p3), %s544_s5, 3 }
  0x1d   : > { %s131_s13 = scalar_lea.sflag (!%p125_p3), [#allocation3], %s544_s5  ;;  %s134_s15 = scalar_lea.vmem (!%p125_p3), [#allocation2], %s273_s12 }
  0x21   : > { %427 = dma.done.wait (%p517_p8), %s131_s13, 128  }
  0x22   : > { %429 = vsyncadd (%p517_p8), %s131_s13, 4294967168  ;;  %s274_s16 = sshll.u32 %s544_s5, 1  ;;  %s276_s17 = sshll.u32 %s448_s9, 1  ;;  %vm158_vm0 = vcmask 1041408   ;;  %v154_v0 = vld [vmem:[%s134_s15] sm:$0x3] }
  0x23   : > { %s179_s24 = scalar_lea.hbm %s592_s1, %s276_s17  ;;  %v155_v1 = vld [vmem:[%s134_s15 + $0x2] sm:$0x3]  ;;  %v156_v2 = vld [vmem:[%s134_s15 + $0x4] sm:$0x3]  ;;  %v157_v3 = vld [vmem:[%s134_s15 + $0x6] sm:$0x3] }
  0x24   : > { %v159_v4 = vsel %vm158_vm0, %v154_v0, -inf  ;;  %v160_v5 = vsel %vm158_vm0, %v155_v1, -inf  ;;  %v161_v6 = vsel %vm158_vm0, %v156_v2, -inf  ;;  %v162_v7 = vsel %vm158_vm0, %v157_v3, -inf  ;;  %s153_s18 = scalar_lea.vmem [#allocation5], %s274_s16  ;;  %s183_s26 = sshll.u32 %s179_s24, 4  ;;  %s184_s26 = int_to_ptr.hbm [resolvable:$true] %s183_s26 }
  0x25   : > { %v163_v8 = vmax.f32 %v159_v4, %v160_v5  ;;  %s181_s25 = sshll.u32 %s153_s18, 4  ;;  %v164_v9 = vmax.f32 %v161_v6, %v162_v7  ;;  %s168_s9 = scalar_lea.sflag [#allocation4], %s544_s5  ;;  %s182_s25 = int_to_ptr.vmem [resolvable:$true] %s181_s25 }
  0x26   : > { %s388_s27 = sshra.s32 %s184_s26, 4  ;;  %s394_s2 = scalar_lea.hbm %s592_s1, 4  ;;  %s389_s27 = int_to_ptr.hbm [resolvable:$true] %s388_s27 }
  0x27   : > { %v165_v10 = vmax.f32 %v163_v8, %v164_v9  ;;  %s390_s28 = scalar_lea.hbm %s389_s27, 2  ;;  %p395_p7 = scmp.lt.s32.totalorder %s389_s27, %s592_s1 }
  0x28   : > { %p391_p4 = scmp.ne.s32.totalorder %s389_s27, %s390_s28  ;;  %p396_p8 = scmp.lt.s32.totalorder %s394_s2, %s390_s28 }
  0x29   : > { %166 = vst [vmem:[%s153_s18] sm:$0x3] %v165_v10 }
  0x2a   : > { %p392_p5 = pnand %p391_p4, %p521_p9  ;;  %p397_p10 = por %p396_p8, %p395_p7 }
  0x2c   : > { %p393_p6 = pneg %p392_p5 }
  0x2e   : > { %p398_p13 = pnand %p397_p10, %p393_p6 }
  0x30   : > { %401 = shalt.err (!%p398_p13)
}
  0x31   : > { %282 = dma.vmem_to_hbm [thread:$0]  (%p521_p9), %s182_s25, 32, %s184_s26, %s168_s9  }
  0x32 PF: > { %s195_s5 = sand.u32 1, %s436_s6   ;;  %p289_p0 = pnand %p268_p12, %p528_p11 }
  0x33   : > { %s196_s12 = scalar_lea.sflag [#allocation4], %s195_s5 }
  0x34   : > { %p290_p1 = pneg %p289_p0 }
  0x36   : > { %431 = dma.done.wait (%p290_p1), %s196_s12, 32  }
  0x37   : > { %433 = vsyncadd (%p290_p1), %s196_s12, 4294967264  ;;  %s17_s11 = sadd.s32 1, %s456_s11   ;;  %s597_s6 = smov %s440_s7 }
  0x38   : > { %p14_p2 = scmp.ge.s32.totalorder %s17_s11, 4   ;;  %s598_s7 = smov %s444_s8 }
  0x39   : > { %s599_s8 = smov %s526_s20  ;;  %s600_s9 = smov %s452_s10 }
  0x3a   : > { %s601_s10 = smov %s603_s14  ;;  %16 = sbr.rel (!%p14_p2) target bundleno = 6 (0x6), region = 69 }
  0x3f   :  { %202 = vsyncpa [#allocation3], 1 }
  0x40   :  { %204 = vsyncpa [#allocation3 + $0x1], 1 }
  0x41   :  { %205 = vsyncpa [#allocation4], 1 }
  0x42   :  { %207 = vsyncpa [#allocation4 + $0x1], 1 }

</bundles_post_ra>
